<compile_context>
chip_gen: v5e
topology: v5e:2x2
jax: 0.10.0
libtpu: 0.0.40
codegen_flags: <defaults>
</compile_context>

<pallas_src>
import jax
import jax.numpy as jnp
from jax.experimental import pallas as pl
from jax.experimental.pallas import tpu as pltpu

BN_EPS = 1e-5
LANE = 128


def _round_up(n, m):
    return ((n + m - 1) // m) * m


def _pad2(a, rows, cols):
    r, c = a.shape
    return jnp.pad(a, ((0, rows - r), (0, cols - c)))


def img_decoder_kernel(x_ref, scale_ref, shift_ref,
                       w1_ref, b1_ref, w2_ref, b2_ref, w3_ref, b3_ref,
                       out_ref):
    # BatchNorm affine (full-batch stats pre-folded into scale/shift by wrapper).
    x = x_ref[...].astype(jnp.float32)
    xn = (x * scale_ref[...] + shift_ref[...]).astype(jnp.bfloat16)

    # denseL1 + ReLU  (bf16 MXU inputs, f32 accumulation)
    h1 = jnp.dot(xn, w1_ref[...], preferred_element_type=jnp.float32) + b1_ref[...]
    h1 = jnp.maximum(h1, 0.0).astype(jnp.bfloat16)

    # denseL2 + ReLU
    h2 = jnp.dot(h1, w2_ref[...], preferred_element_type=jnp.float32) + b2_ref[...]
    h2 = jnp.maximum(h2, 0.0).astype(jnp.bfloat16)

    # denseL3 + ReLU
    h3 = jnp.dot(h2, w3_ref[...], preferred_element_type=jnp.float32) + b3_ref[...]
    h3 = jnp.maximum(h3, 0.0)

    out_ref[...] = h3.astype(out_ref.dtype)


@jax.jit
def img_decoder_forward(x, params):
    """x: (B, input_dim) float32. params: dict of arrays (weights stored (in, out))."""
    B, F_in = x.shape
    H1 = params["w1"].shape[1]
    H2 = params["w2"].shape[1]
    F_out = params["w3"].shape[1]

    # ---- BatchNorm1d training-mode stats over the FULL batch (wrapper side so
    # batch tiling can't change semantics and the grid stays truly parallel). ----
    xf = x.astype(jnp.float32)
    mean = jnp.mean(xf, axis=0, keepdims=True)
    var = jnp.mean(jnp.square(xf - mean), axis=0, keepdims=True)   # biased, as nn.BatchNorm1d
    scale = params["gamma"] * jax.lax.rsqrt(var + BN_EPS)          # (1, F_in)
    shift = params["beta"] - mean * scale                          # (1, F_in)

    # ---- Lane-dense padding of every feature dim (zeros stay zero net-wide). ----
    F_in_p, H1_p = _round_up(F_in, LANE), _round_up(H1, LANE)
    H2_p, F_out_p = _round_up(H2, LANE), _round_up(F_out, LANE)

    # ---- Batch tiling: MXU-sized tiles when the batch allows it; pad the batch
    # to a multiple of the tile so every grid block is full (no ragged block). ----
    if B >= 256:
        TB = 256
    elif B >= 128:
        TB = 128
    else:
        TB = B                      # small batch -> single full-batch block
    B_p = _round_up(B, TB)
    grid = (B_p // TB,)

    xp = _pad2(xf, B_p, F_in_p)
    scale_p = _pad2(scale, 1, F_in_p)
    shift_p = _pad2(shift, 1, F_in_p)
    w1 = _pad2(params["w1"], F_in_p, H1_p).astype(jnp.bfloat16)
    w2 = _pad2(params["w2"], H1_p, H2_p).astype(jnp.bfloat16)
    w3 = _pad2(params["w3"], H2_p, F_out_p).astype(jnp.bfloat16)
    b1 = _pad2(params["b1"], 1, H1_p)
    b2 = _pad2(params["b2"], 1, H2_p)
    b3 = _pad2(params["b3"], 1, F_out_p)

    x_spec = pl.BlockSpec((TB, F_in_p), lambda i: (i, 0))
    out_spec = pl.BlockSpec((TB, F_out_p), lambda i: (i, 0))

    def resident(shape):            # fetched once, VMEM-resident across the grid
        return pl.BlockSpec(shape, lambda i: (0, 0))

    # VMEM budget: resident bf16 weights + vectors + double-buffered x/out tiles
    # + per-tile f32 intermediates, with 2x headroom; capped for v7x (64 MiB).
    resident_bytes = 2 * (F_in_p * H1_p + H1_p * H2_p + H2_p * F_out_p)
    vec_bytes = 4 * (2 * F_in_p + H1_p + H2_p + F_out_p)
    tile_bytes = 2 * 4 * TB * (F_in_p + F_out_p)
    interm_bytes = 4 * TB * (F_in_p + H1_p + H2_p + F_out_p)
    est = resident_bytes + vec_bytes + tile_bytes + interm_bytes
    vmem_limit = int(min(max(2 * est, 32 * 1024 * 1024), 64 * 1024 * 1024))

    out_padded = pl.pallas_call(
        img_decoder_kernel,
        out_shape=jax.ShapeDtypeStruct((B_p, F_out_p), jnp.float32),
        grid=grid,
        in_specs=[x_spec,
                  resident((1, F_in_p)), resident((1, F_in_p)),
                  resident((F_in_p, H1_p)), resident((1, H1_p)),
                  resident((H1_p, H2_p)), resident((1, H2_p)),
                  resident((H2_p, F_out_p)), resident((1, F_out_p))],
        out_specs=out_spec,
        compiler_params=pltpu.CompilerParams(
            dimension_semantics=("parallel",),
            vmem_limit_bytes=vmem_limit),
    )(xp, scale_p, shift_p, w1, b1, w2, b2, w3, b3)

    return out_padded[:B, :F_out]


def init_params(key, input_dim, hidden_dim, output_dim):
    """Deterministic synthetic parameters (weights stored as (in, out), float32)."""
    ks = jax.random.split(key, 6)

    def linear(kw, kb, fan_in, fan_out):
        bound = 1.0 / jnp.sqrt(jnp.float32(fan_in))
        w = jax.random.uniform(kw, (fan_in, fan_out), jnp.float32, -bound, bound)
        b = jax.random.uniform(kb, (1, fan_out), jnp.float32, -bound, bound)
        return w, b

    w1, b1 = linear(ks[0], ks[1], input_dim, hidden_dim)
    w2, b2 = linear(ks[2], ks[3], hidden_dim, hidden_dim * 2)
    w3, b3 = linear(ks[4], ks[5], hidden_dim * 2, output_dim)

    return {
        "gamma": jnp.ones((1, input_dim), jnp.float32),   # BN weight init = 1
        "beta": jnp.zeros((1, input_dim), jnp.float32),   # BN bias  init = 0
        "w1": w1, "b1": b1,
        "w2": w2, "b2": b2,
        "w3": w3, "b3": b3,
    }


def reference_forward_f32(x, p):
    """Pure-f32 reference matching the PyTorch module (training-mode BN)."""
    mean = jnp.mean(x, axis=0, keepdims=True)
    var = jnp.mean((x - mean) ** 2, axis=0, keepdims=True)
    xn = (x - mean) / jnp.sqrt(var + BN_EPS) * p["gamma"] + p["beta"]
    h1 = jax.nn.relu(xn @ p["w1"] + p["b1"])
    h2 = jax.nn.relu(h1 @ p["w2"] + p["b2"])
    h3 = jax.nn.relu(h2 @ p["w3"] + p["b3"])
    return h3


def reference_forward_bf16(x, p):
    """Numerics-matched reference: same bf16-MXU / f32-accumulate pipeline as the kernel."""
    mean = jnp.mean(x, axis=0, keepdims=True)
    var = jnp.mean(jnp.square(x - mean), axis=0, keepdims=True)
    scale = p["gamma"] * jax.lax.rsqrt(var + BN_EPS)
    shift = p["beta"] - mean * scale
    xn = (x * scale + shift).astype(jnp.bfloat16)

    def layer(h, w, b):
        y = jnp.dot(h, w.astype(jnp.bfloat16), preferred_element_type=jnp.float32) + b
        return jnp.maximum(y, 0.0)

    h1 = layer(xn, p["w1"], p["b1"]).astype(jnp.bfloat16)
    h2 = layer(h1, p["w2"], p["b2"]).astype(jnp.bfloat16)
    h3 = layer(h2, p["w3"], p["b3"])
    return h3


if __name__ == "__main__":
    # Small shapes consistent with the module (scaled-down dims).
    batch, input_dim, hidden_dim, output_dim = 8, 32, 64, 32

    key = jax.random.PRNGKey(0)
    kx, kp = jax.random.split(key)
    x = jax.random.normal(kx, (batch, input_dim), jnp.float32)
    params = init_params(kp, input_dim, hidden_dim, output_dim)

    out = img_decoder_forward(x, params)
    out = jax.block_until_ready(out)
    assert out.shape == (batch, output_dim)

    # Tight check vs the numerics-matched (bf16 matmul, f32 accumulate) reference.
    ref_bf16 = reference_forward_bf16(x, params)
    assert jnp.allclose(out, ref_bf16, atol=2e-3, rtol=2e-3), "mismatch vs bf16-matched reference"

    # Looser sanity check vs the pure-f32 module reference (bf16 weight rounding).
    ref_f32 = reference_forward_f32(x, params)
    assert jnp.allclose(out, ref_f32, atol=5e-2, rtol=5e-2), "mismatch vs f32 reference"

    print("KERNEL_OK")
</pallas_src>

<mosaic_0001>
module attributes {stable_mosaic.version = 11 : i64} {
  func.func @img_decoder_kernel(%arg0: i32, %arg1: memref<8x128xf32, #tpu.memory_space<vmem>>, %arg2: memref<1x128xf32, #tpu.memory_space<vmem>>, %arg3: memref<1x128xf32, #tpu.memory_space<vmem>>, %arg4: memref<128x128xbf16, #tpu.memory_space<vmem>>, %arg5: memref<1x128xf32, #tpu.memory_space<vmem>>, %arg6: memref<128x128xbf16, #tpu.memory_space<vmem>>, %arg7: memref<1x128xf32, #tpu.memory_space<vmem>>, %arg8: memref<128x128xbf16, #tpu.memory_space<vmem>>, %arg9: memref<1x128xf32, #tpu.memory_space<vmem>>, %arg10: memref<8x128xf32, #tpu.memory_space<vmem>>) attributes {dimension_semantics = [#tpu.dimension_semantics<parallel>], iteration_bounds = array<i64: 1>, scalar_prefetch = 0 : i64, scratch_operands = 0 : i64, tpu.core_type = #tpu.core_type<tc>, window_params = [{transform_indices = @transform_0, window_bounds = array<i64: 8, 128>}, {pipeline_mode = #tpu.pipeline_mode<synchronous>, transform_indices = @transform_1, window_bounds = array<i64: 1, 128>}, {pipeline_mode = #tpu.pipeline_mode<synchronous>, transform_indices = @transform_2, window_bounds = array<i64: 1, 128>}, {pipeline_mode = #tpu.pipeline_mode<synchronous>, transform_indices = @transform_3, window_bounds = array<i64: 128, 128>}, {pipeline_mode = #tpu.pipeline_mode<synchronous>, transform_indices = @transform_4, window_bounds = array<i64: 1, 128>}, {pipeline_mode = #tpu.pipeline_mode<synchronous>, transform_indices = @transform_5, window_bounds = array<i64: 128, 128>}, {pipeline_mode = #tpu.pipeline_mode<synchronous>, transform_indices = @transform_6, window_bounds = array<i64: 1, 128>}, {pipeline_mode = #tpu.pipeline_mode<synchronous>, transform_indices = @transform_7, window_bounds = array<i64: 128, 128>}, {pipeline_mode = #tpu.pipeline_mode<synchronous>, transform_indices = @transform_8, window_bounds = array<i64: 1, 128>}, {transform_indices = @transform_9, window_bounds = array<i64: 8, 128>}]} {
    %c0 = arith.constant 0 : index
    %c0_0 = arith.constant 0 : index
    %0 = vector.load %arg1[%c0, %c0_0] : memref<8x128xf32, #tpu.memory_space<vmem>>, vector<8x128xf32>
    %c0_1 = arith.constant 0 : index
    %c0_2 = arith.constant 0 : index
    %1 = vector.load %arg2[%c0_1, %c0_2] : memref<1x128xf32, #tpu.memory_space<vmem>>, vector<1x128xf32>
    %2 = vector.broadcast %1 : vector<1x128xf32> to vector<8x128xf32>
    %3 = arith.mulf %0, %2 : vector<8x128xf32>
    %c0_3 = arith.constant 0 : index
    %c0_4 = arith.constant 0 : index
    %4 = vector.load %arg3[%c0_3, %c0_4] : memref<1x128xf32, #tpu.memory_space<vmem>>, vector<1x128xf32>
    %5 = vector.broadcast %4 : vector<1x128xf32> to vector<8x128xf32>
    %6 = arith.addf %3, %5 : vector<8x128xf32>
    %7 = arith.truncf %6 : vector<8x128xf32> to vector<8x128xbf16>
    %c0_5 = arith.constant 0 : index
    %c0_6 = arith.constant 0 : index
    %8 = vector.load %arg4[%c0_5, %c0_6] : memref<128x128xbf16, #tpu.memory_space<vmem>>, vector<128x128xbf16>
    %cst = arith.constant dense<0.000000e+00> : vector<8x128xf32>
    %9 = tpu.matmul %7, %8, %cst {dimension_numbers = #tpu.dot_dimension_numbers<[1], [0], [0], [1], [0, 0, 1, 1], [], []>} : vector<8x128xbf16>, vector<128x128xbf16>, vector<8x128xf32> -> vector<8x128xf32>
    %c0_7 = arith.constant 0 : index
    %c0_8 = arith.constant 0 : index
    %10 = vector.load %arg5[%c0_7, %c0_8] : memref<1x128xf32, #tpu.memory_space<vmem>>, vector<1x128xf32>
    %11 = vector.broadcast %10 : vector<1x128xf32> to vector<8x128xf32>
    %12 = arith.addf %9, %11 : vector<8x128xf32>
    %cst_9 = arith.constant 0.000000e+00 : f32
    %13 = vector.broadcast %cst_9 : f32 to vector<8x128xf32>
    %14 = arith.maximumf %12, %13 : vector<8x128xf32>
    %15 = arith.truncf %14 : vector<8x128xf32> to vector<8x128xbf16>
    %c0_10 = arith.constant 0 : index
    %c0_11 = arith.constant 0 : index
    %16 = vector.load %arg6[%c0_10, %c0_11] : memref<128x128xbf16, #tpu.memory_space<vmem>>, vector<128x128xbf16>
    %cst_12 = arith.constant dense<0.000000e+00> : vector<8x128xf32>
    %17 = tpu.matmul %15, %16, %cst_12 {dimension_numbers = #tpu.dot_dimension_numbers<[1], [0], [0], [1], [0, 0, 1, 1], [], []>} : vector<8x128xbf16>, vector<128x128xbf16>, vector<8x128xf32> -> vector<8x128xf32>
    %c0_13 = arith.constant 0 : index
    %c0_14 = arith.constant 0 : index
    %18 = vector.load %arg7[%c0_13, %c0_14] : memref<1x128xf32, #tpu.memory_space<vmem>>, vector<1x128xf32>
    %19 = vector.broadcast %18 : vector<1x128xf32> to vector<8x128xf32>
    %20 = arith.addf %17, %19 : vector<8x128xf32>
    %cst_15 = arith.constant 0.000000e+00 : f32
    %21 = vector.broadcast %cst_15 : f32 to vector<8x128xf32>
    %22 = arith.maximumf %20, %21 : vector<8x128xf32>
    %23 = arith.truncf %22 : vector<8x128xf32> to vector<8x128xbf16>
    %c0_16 = arith.constant 0 : index
    %c0_17 = arith.constant 0 : index
    %24 = vector.load %arg8[%c0_16, %c0_17] : memref<128x128xbf16, #tpu.memory_space<vmem>>, vector<128x128xbf16>
    %cst_18 = arith.constant dense<0.000000e+00> : vector<8x128xf32>
    %25 = tpu.matmul %23, %24, %cst_18 {dimension_numbers = #tpu.dot_dimension_numbers<[1], [0], [0], [1], [0, 0, 1, 1], [], []>} : vector<8x128xbf16>, vector<128x128xbf16>, vector<8x128xf32> -> vector<8x128xf32>
    %c0_19 = arith.constant 0 : index
    %c0_20 = arith.constant 0 : index
    %26 = vector.load %arg9[%c0_19, %c0_20] : memref<1x128xf32, #tpu.memory_space<vmem>>, vector<1x128xf32>
    %27 = vector.broadcast %26 : vector<1x128xf32> to vector<8x128xf32>
    %28 = arith.addf %25, %27 : vector<8x128xf32>
    %cst_21 = arith.constant 0.000000e+00 : f32
    %29 = vector.broadcast %cst_21 : f32 to vector<8x128xf32>
    %30 = arith.maximumf %28, %29 : vector<8x128xf32>
    %c0_22 = arith.constant 0 : index
    %c0_23 = arith.constant 0 : index
    %31 = vector.load %arg10[%c0_22, %c0_23] : memref<8x128xf32, #tpu.memory_space<vmem>>, vector<8x128xf32>
    tpu.vector_store %arg10[%c0_22, %c0_23], %30 {strides = array<i32>} : memref<8x128xf32, #tpu.memory_space<vmem>>, vector<8x128xf32>,
    return
  }
  func.func @transform_0(%arg0: i32) -> (i32, i32) {
    %c0_i32 = arith.constant 0 : i32
    %c0_i32_0 = arith.constant 0 : i32
    return %arg0, %c0_i32 : i32, i32
  }
  func.func @transform_1(%arg0: i32) -> (i32, i32) {
    %c0_i32 = arith.constant 0 : i32
    %c0_i32_0 = arith.constant 0 : i32
    %c0_i32_1 = arith.constant 0 : i32
    return %c0_i32, %c0_i32_0 : i32, i32
  }
  func.func @transform_2(%arg0: i32) -> (i32, i32) {
    %c0_i32 = arith.constant 0 : i32
    %c0_i32_0 = arith.constant 0 : i32
    %c0_i32_1 = arith.constant 0 : i32
    return %c0_i32, %c0_i32_0 : i32, i32
  }
  func.func @transform_3(%arg0: i32) -> (i32, i32) {
    %c0_i32 = arith.constant 0 : i32
    %c0_i32_0 = arith.constant 0 : i32
    %c0_i32_1 = arith.constant 0 : i32
    return %c0_i32, %c0_i32_0 : i32, i32
  }
  func.func @transform_4(%arg0: i32) -> (i32, i32) {
    %c0_i32 = arith.constant 0 : i32
    %c0_i32_0 = arith.constant 0 : i32
    %c0_i32_1 = arith.constant 0 : i32
    return %c0_i32, %c0_i32_0 : i32, i32
  }
  func.func @transform_5(%arg0: i32) -> (i32, i32) {
    %c0_i32 = arith.constant 0 : i32
    %c0_i32_0 = arith.constant 0 : i32
    %c0_i32_1 = arith.constant 0 : i32
    return %c0_i32, %c0_i32_0 : i32, i32
  }
  func.func @transform_6(%arg0: i32) -> (i32, i32) {
    %c0_i32 = arith.constant 0 : i32
    %c0_i32_0 = arith.constant 0 : i32
    %c0_i32_1 = arith.constant 0 : i32
    return %c0_i32, %c0_i32_0 : i32, i32
  }
  func.func @transform_7(%arg0: i32) -> (i32, i32) {
    %c0_i32 = arith.constant 0 : i32
    %c0_i32_0 = arith.constant 0 : i32
    %c0_i32_1 = arith.constant 0 : i32
    return %c0_i32, %c0_i32_0 : i32, i32
  }
  func.func @transform_8(%arg0: i32) -> (i32, i32) {
    %c0_i32 = arith.constant 0 : i32
    %c0_i32_0 = arith.constant 0 : i32
    %c0_i32_1 = arith.constant 0 : i32
    return %c0_i32, %c0_i32_0 : i32, i32
  }
  func.func @transform_9(%arg0: i32) -> (i32, i32) {
    %c0_i32 = arith.constant 0 : i32
    %c0_i32_0 = arith.constant 0 : i32
    return %arg0, %c0_i32 : i32, i32
  }
}

</mosaic_0001>

<bundles_post_ra>
// kernel: img_decoder_forward.1
= control target key start
LH: loop header
LB: loop body
LE: loop exit
PB: predicated region body
PF: predicated region fallthrough
CT: control target
= control target key end

     0   :  { %s606_s0 = inlined_call_operand.vmem [shape: f32[8,128], index: 0, kind: input, shape index: {}]   ;;  %s607_s1 = inlined_call_operand.vmem [shape: f32[1,128], index: 1, kind: input, shape index: {}]   ;;  %s608_s2 = inlined_call_operand.vmem [shape: f32[1,128], index: 2, kind: input, shape index: {}]   ;;  %s609_s3 = inlined_call_operand.vmem [shape: bf16[128,128], index: 3, kind: input, shape index: {}]   ;;  %s610_s4 = inlined_call_operand.vmem [shape: f32[1,128], index: 4, kind: input, shape index: {}]   ;;  %s611_s5 = inlined_call_operand.vmem [shape: bf16[128,128], index: 5, kind: input, shape index: {}]   ;;  %s612_s6 = inlined_call_operand.vmem [shape: f32[1,128], index: 6, kind: input, shape index: {}]   ;;  %s613_s7 = inlined_call_operand.vmem [shape: bf16[128,128], index: 7, kind: input, shape index: {}]   ;;  %s614_s8 = inlined_call_operand.vmem [shape: f32[1,128], index: 8, kind: input, shape index: {}]   ;;  %s615_s9 = inlined_call_operand.hbm [shape: f32[8,128], index: 9, kind: output, shape index: {}]  }
   0x1   :  { %v413_v0 = vld [vmem:[%s609_s3 + $0x38] sm:$0xff]  ;;  %v412_v1 = vld [vmem:[%s609_s3 + $0x30] sm:$0xff]  ;;  %v411_v3 = vld [vmem:[%s609_s3 + $0x28] sm:$0xff] }
   0x2   :  { %113 = vmatpush.bf16.msra.mxu0 %v413_v0  ;;  %v421_v2 = vld [vmem:[%s611_s5 + $0x38] sm:$0xff]  ;;  %v420_v4 = vld [vmem:[%s611_s5 + $0x30] sm:$0xff] }
   0x3   :  { %196 = vmatpush.bf16.msra.mxu1 %v421_v2 }
   0x6   :  { %114 = vmatpush.bf16.msra.mxu0 %v412_v1 }
   0x7   :  { %14 = vsyncpa [#allocation3], 0  ;;  %v410_v5 = vld [vmem:[%s609_s3 + $0x20] sm:$0xff]  ;;  %197 = vmatpush.bf16.msra.mxu1 %v420_v4  ;;  %v419_v6 = vld [vmem:[%s611_s5 + $0x28] sm:$0xff]  ;;  %s462_s19 = smov [#allocation2]   ;;  %s301_s21 = sshll.u32 %s615_s9, 4  ;;  %s302_s21 = int_to_ptr.hbm [resolvable:$true] %s301_s21 }
   0x8   :  { %v409_v7 = vld [vmem:[%s609_s3 + $0x18] sm:$0xff]  ;;  %v418_v8 = vld [vmem:[%s611_s5 + $0x20] sm:$0xff]  ;;  %v408_v10 = vld [vmem:[%s609_s3 + $0x10] sm:$0xff] }
   0x9   :  { %v431_v9 = vld [vmem:[%s607_s1] ss:$0 sm:$0xff]  ;;  %v417_v12 = vld [vmem:[%s611_s5 + $0x18] sm:$0xff]  ;;  %v407_v15 = vld [vmem:[%s609_s3 + $0x8] sm:$0xff] }
   0xa   :  { %115 = vmatpush.bf16.msra.mxu0 %v411_v3  ;;  %v33_v11 = vld [vmem:[%s606_s0] sm:$0xff]  ;;  %v416_v16 = vld [vmem:[%s611_s5 + $0x10] sm:$0xff]  ;;  %v415_v20 = vld [vmem:[%s611_s5 + $0x8] sm:$0xff] }
   0xb   :  { %198 = vmatpush.bf16.msra.mxu1 %v419_v6  ;;  %v38_v13 = vmul.f32 %v431_v9, %v33_v11  ;;  %v432_v14 = vld [vmem:[%s608_s2] ss:$0 sm:$0xff]  ;;  %v429_v22 = vld [vmem:[%s613_s7 + $0x38] sm:$0xff]  ;;  %v428_v23 = vld [vmem:[%s613_s7 + $0x30] sm:$0xff]  ;;  %s299_s2 = sshll.u32 %s462_s19, 4  ;;  %s300_s2 = int_to_ptr.vmem [resolvable:$true] %s299_s2 }
   0xc   :  { %v406_v18 = vld [vmem:[%s609_s3] sm:$0xff]  ;;  %279 = vmatpush.bf16.msra.mxu2 %v429_v22  ;;  %v427_v24 = vld [vmem:[%s613_s7 + $0x28] sm:$0xff]  ;;  %v425_v26 = vld [vmem:[%s613_s7 + $0x18] sm:$0xff] }
   0xd   :  { %v43_v17 = vadd.f32 %v432_v14, %v38_v13  ;;  %v414_v21 = vld [vmem:[%s611_s5] sm:$0xff]  ;;  %v424_v27 = vld [vmem:[%s613_s7 + $0x10] sm:$0xff]  ;;  %v423_v34 = vld [vmem:[%s613_s7 + $0x8] sm:$0xff] }
   0xe   :  { %116 = vmatpush.bf16.msra.mxu0 %v410_v5  ;;  %v426_v25 = vld [vmem:[%s613_s7 + $0x20] sm:$0xff] }
   0xf   :  { %199 = vmatpush.bf16.msra.mxu1 %v418_v8  ;;  %v44_v19 = vpack.c.bf16 %v43_v17, %v43_v17  ;;  %v433_v28 = vld [vmem:[%s610_s4] ss:$0 sm:$0xff] }
  0x10   :  { %280 = vmatpush.bf16.msra.mxu2 %v428_v23  ;;  %v422_v35 = vld [vmem:[%s613_s7] sm:$0xff] }
  0x11   :  { %v434_v36 = vld [vmem:[%s612_s6] ss:$0 sm:$0xff] }
  0x12   :  { %117 = vmatpush.bf16.msra.mxu0 %v409_v7  ;;  %v435_v42 = vld [vmem:[%s614_s8] ss:$0 sm:$0xff] }
  0x13   :  { %200 = vmatpush.bf16.msra.mxu1 %v417_v12 }
  0x14   :  { %281 = vmatpush.bf16.msra.mxu2 %v427_v24 }
  0x16   :  { %118 = vmatpush.bf16.msra.mxu0 %v408_v10 }
  0x17   :  { %201 = vmatpush.bf16.msra.mxu1 %v416_v16 }
  0x18   :  { %282 = vmatpush.bf16.msra.mxu2 %v426_v25 }
  0x1a   :  { %119 = vmatpush.bf16.msra.mxu0 %v407_v15 }
  0x1b   :  { %202 = vmatpush.bf16.msra.mxu1 %v415_v20 }
  0x1c   :  { %283 = vmatpush.bf16.msra.mxu2 %v425_v26 }
  0x1e   :  { %120 = vmatpush.bf16.msra.mxu0 %v406_v18 }
  0x1f   :  { %203 = vmatpush.bf16.msra.mxu1 %v414_v21 }
  0x20   :  { %284 = vmatpush.bf16.msra.mxu2 %v424_v27 }
  0x21   :  { %121 = vmatmul.bf16.vlgmr.msra.gmra.mxu0 %v44_v19 }
  0x24   :  { %285 = vmatpush.bf16.msra.mxu2 %v423_v34 }
  0x28   :  { %286 = vmatpush.bf16.msra.mxu2 %v422_v35 }
  0x9e   :  { %v122_v29 = vpop.f32.mrf.mxu0 }
  0x9f   :  { %v123_v30 = vadd.f32 %v433_v28, %v122_v29 }
  0xa1   :  { %v126_v31 = vmax.f32 %v123_v30, 0.0 }
  0xa3   :  { %v127_v32 = vpack.c.bf16 %v126_v31, %v126_v31 }
  0xa5   :  { %204 = vmatmul.bf16.vlgmr.msra.gmra.mxu1 %v127_v32 }
  0xa6   :  { %v124_v33 = vpop.f32.mrf.mxu0 }
 0x122   :  { %v205_v37 = vpop.f32.mrf.mxu1 }
 0x123   :  { %v206_v38 = vadd.f32 %v434_v36, %v205_v37 }
 0x125   :  { %v209_v39 = vmax.f32 %v206_v38, 0.0 }
 0x127   :  { %v210_v40 = vpack.c.bf16 %v209_v39, %v209_v39 }
 0x129   :  { %287 = vmatmul.bf16.vlgmr.msra.gmra.mxu2 %v210_v40 }
 0x12a   :  { %v207_v41 = vpop.f32.mrf.mxu1 }
 0x1ac   :  { %v288_v43 = vpop.f32.mrf.mxu2 }
 0x1ad   :  { %v289_v44 = vadd.f32 %v435_v42, %v288_v43 }
 0x1af   :  { %v292_v45 = vmax.f32 %v289_v44, 0.0 }
 0x1b1   :  { %293 = vst [vmem:[#allocation2] sm:$0xff] %v292_v45 }
 0x1b2   :  { %304 = dma.vmem_to_hbm [thread:$0]  %s300_s2, 128, %s302_s21, [#allocation3]  }
 0x1b4   :  { %v290_v46 = vpop.f32.mrf.mxu2 }
 0x1b5   :  { %460 = dma.done.wait [#allocation3], 128  }
 0x1b6   :  { %461 = vsyncadd [#allocation3], 4294967168 }
 0x1b7   :  { %309 = vsyncpa [#allocation3], 1 }

</bundles_post_ra>
